<compile_context>
chip_gen: v7x
topology: tpu7x:2x2x1
jax: 0.10.0
libtpu: 0.0.40
codegen_flags: <defaults>
</compile_context>

<pallas_src>
import functools

import numpy as np
import jax
import jax.numpy as jnp
from jax import lax
from jax.experimental import pallas as pl
from jax.experimental.pallas import tpu as pltpu

NEG_INF = -1.0e30          # python float -> baked as a literal
MAX_BLOCK_R = 32           # 32 sublane-rows * 128 lanes = 4096 anchors per kernel-1 step
NMS_UNROLL = 4             # manual unroll factor of the greedy-NMS scan

# ----------------------------------------------------------------------------
# Config (mirrors cfg[cfg_key].* of the PyTorch module)
# ----------------------------------------------------------------------------
CFG = {
    "TEST": dict(
        RPN_PRE_NMS_TOP_N=256,
        RPN_POST_NMS_TOP_N=64,
        RPN_NMS_THRESH=0.7,
        RPN_MIN_SIZE=4.0,
    )
}


# ----------------------------------------------------------------------------
# Anchor generation (deterministic parameter setup; plain numpy glue)
# ----------------------------------------------------------------------------
def generate_anchor_template(base_size=16, ratios=None, scales=None):
    """Standard py-faster-rcnn anchor template, shape (K, 4) in (x1, y1, x2, y2)."""
    ratios = np.array([0.5, 1.0, 2.0] if ratios is None else ratios, dtype=np.float64)
    scales = np.array([8.0, 16.0, 32.0] if scales is None else scales, dtype=np.float64)
    base = np.array([0, 0, base_size - 1, base_size - 1], dtype=np.float64)

    def _whctrs(a):
        w = a[2] - a[0] + 1.0
        h = a[3] - a[1] + 1.0
        return w, h, a[0] + 0.5 * (w - 1.0), a[1] + 0.5 * (h - 1.0)

    def _mk(ws, hs, xc, yc):
        ws = ws[:, None]
        hs = hs[:, None]
        return np.hstack(
            [xc - 0.5 * (ws - 1.0), yc - 0.5 * (hs - 1.0),
             xc + 0.5 * (ws - 1.0), yc + 0.5 * (hs - 1.0)]
        )

    w, h, xc, yc = _whctrs(base)
    size = w * h
    ws = np.round(np.sqrt(size / ratios))
    hs = np.round(ws * ratios)
    ratio_anchors = _mk(ws, hs, xc, yc)

    out = []
    for i in range(ratio_anchors.shape[0]):
        w, h, xc, yc = _whctrs(ratio_anchors[i])
        out.append(_mk(w * scales, h * scales, xc, yc))
    return np.vstack(out).astype(np.float32)


def generate_raw_image_anchor(feature_height, feature_width, anchors_template, feat_stride):
    """All-image anchors, shape (H*W*K, 4); a = (y*W + x)*K + k."""
    shift_x = np.arange(feature_width, dtype=np.float32) * feat_stride
    shift_y = np.arange(feature_height, dtype=np.float32) * feat_stride
    sx, sy = np.meshgrid(shift_x, shift_y)  # y-major, x fastest
    shifts = np.stack([sx.ravel(), sy.ravel(), sx.ravel(), sy.ravel()], axis=1)
    anchors = anchors_template[None, :, :] + shifts[:, None, :]
    return anchors.reshape(-1, 4).astype(np.float32)


def _round_up(x, m):
    return ((x + m - 1) // m) * m


def _cdiv(a, b):
    return (a + b - 1) // b


# ----------------------------------------------------------------------------
# Kernel 1: bbox decode (amend_bbox) + clip + min-size filter (score masking)
# All per-coordinate operands are (block_r, 128) slabs -> fully packed vregs.
# ----------------------------------------------------------------------------
def _decode_kernel(hw_ref, anc_ref, delta_ref, score_ref, roi_ref, mscore_ref, *, min_size):
    # hw_ref: SMEM int32 [h, w] (scalar prefetch, runtime image size)
    h_img = hw_ref[0].astype(jnp.float32)
    w_img = hw_ref[1].astype(jnp.float32)

    ax1 = anc_ref[0]        # (block_r, 128)
    ay1 = anc_ref[1]
    ax2 = anc_ref[2]
    ay2 = anc_ref[3]

    # amend_bbox: standard bbox_transform_inv decode (py-faster-rcnn +1 convention)
    aw = ax2 - ax1 + 1.0
    ah = ay2 - ay1 + 1.0
    acx = ax1 + 0.5 * aw
    acy = ay1 + 0.5 * ah

    dx = delta_ref[0, 0]
    dy = delta_ref[0, 1]
    dw = delta_ref[0, 2]
    dh = delta_ref[0, 3]

    cx = dx * aw + acx
    cy = dy * ah + acy
    pw = jnp.exp(dw) * aw   # exactly two exps per anchor (EUP slot)
    ph = jnp.exp(dh) * ah

    # clip_: x coords to [0, w], y coords to [0, h]  (matches the given PyTorch spec)
    x1 = jnp.clip(cx - 0.5 * pw, 0.0, w_img)
    y1 = jnp.clip(cy - 0.5 * ph, 0.0, h_img)
    x2 = jnp.clip(cx + 0.5 * pw, 0.0, w_img)
    y2 = jnp.clip(cy + 0.5 * ph, 0.0, h_img)

    # _filter_roi: keep (y2-y1) > min_size and (x2-x1) > min_size (as in the spec);
    # filtered boxes get score = -inf so they never survive top-k / NMS.
    keep = ((y2 - y1) > min_size) & ((x2 - x1) > min_size)

    # per-coordinate stores (no concatenate; each is one clean (block_r,128) slab)
    roi_ref[0, 0] = x1
    roi_ref[0, 1] = y1
    roi_ref[0, 2] = x2
    roi_ref[0, 3] = y2
    mscore_ref[0] = jnp.where(keep, score_ref[0], NEG_INF)


def decode_clip_filter(hw_i32, anchors_p, deltas_p, scores_p, min_size, block_r):
    B = deltas_p.shape[0]
    R_pad = deltas_p.shape[2]
    grid = (B, R_pad // block_r)
    grid_spec = pltpu.PrefetchScalarGridSpec(
        num_scalar_prefetch=1,
        grid=grid,
        in_specs=[
            pl.BlockSpec((4, block_r, 128), lambda b, j, hw: (0, j, 0)),
            pl.BlockSpec((1, 4, block_r, 128), lambda b, j, hw: (b, 0, j, 0)),
            pl.BlockSpec((1, block_r, 128), lambda b, j, hw: (b, j, 0)),
        ],
        out_specs=[
            pl.BlockSpec((1, 4, block_r, 128), lambda b, j, hw: (b, 0, j, 0)),
            pl.BlockSpec((1, block_r, 128), lambda b, j, hw: (b, j, 0)),
        ],
    )
    rois_p, mscores_p = pl.pallas_call(
        functools.partial(_decode_kernel, min_size=float(min_size)),
        out_shape=(
            jax.ShapeDtypeStruct((B, 4, R_pad, 128), jnp.float32),
            jax.ShapeDtypeStruct((B, R_pad, 128), jnp.float32),
        ),
        grid_spec=grid_spec,
        compiler_params=pltpu.CompilerParams(
            dimension_semantics=("parallel", "parallel")
        ),
    )(hw_i32, anchors_p, deltas_p, scores_p)
    return rois_p, mscores_p


# ----------------------------------------------------------------------------
# Kernel 2: fused pairwise-IoU + greedy NMS (per batch image).
# Boxes are already sorted by descending score.  Box-i scalars come from an SMEM copy
# (plain scalar loads); only the suppression bit of box i needs a cross-lane reduction.
# The scan is unrolled by NMS_UNROLL and blocks past n_valid are skipped.
# ----------------------------------------------------------------------------
def _iou_nms_kernel(nvalid_ref, boxscal_ref, boxes_ref, keep_ref, supp_ref, *,
                    thresh, n_boxes, unroll):
    b = pl.program_id(0)

    x1 = boxes_ref[0, 0]                       # (R2, 128), fully packed vregs
    y1 = boxes_ref[0, 1]
    x2 = boxes_ref[0, 2]
    y2 = boxes_ref[0, 3]
    area = (x2 - x1 + 1.0) * (y2 - y1 + 1.0)
    r2 = x1.shape[0]
    col = (lax.broadcasted_iota(jnp.int32, (r2, 128), 0) * 128
           + lax.broadcasted_iota(jnp.int32, (r2, 128), 1))   # flat box index per lane

    supp_ref[...] = jnp.zeros_like(supp_ref)   # 1.0 = suppressed

    n_valid = jnp.minimum(nvalid_ref[b], n_boxes)
    base_b = b * n_boxes * 5
    num_blocks = n_boxes // unroll             # static trip count

    @pl.loop(0, num_blocks)
    def _(blk):
        # Boxes at index >= n_valid are filtered/padding (score = -inf); they sort after
        # all valid boxes and could only suppress other invalid boxes -> safe to skip.
        @pl.when(blk * unroll < n_valid)
        def _():
            supp = supp_ref[...]
            for u in range(unroll):            # manual unroll: IoU rows of i+1.. are
                i = blk * unroll + u           # independent of supp(i) -> overlappable
                base = base_b + i * 5
                x1_i = boxscal_ref[base + 0]   # scalar SMEM loads (free scalar slots)
                y1_i = boxscal_ref[base + 1]
                x2_i = boxscal_ref[base + 2]
                y2_i = boxscal_ref[base + 3]
                area_i = boxscal_ref[base + 4]
                # single remaining cross-lane reduction: suppression bit of box i
                supp_i = jnp.sum(jnp.where(col == i, supp, 0.0))

                iw = jnp.maximum(jnp.minimum(x2_i, x2) - jnp.maximum(x1_i, x1) + 1.0, 0.0)
                ih = jnp.maximum(jnp.minimum(y2_i, y2) - jnp.maximum(y1_i, y1) + 1.0, 0.0)
                inter = iw * ih
                # exact division (IoU values near the 0.7 threshold must not be perturbed)
                iou_row = inter / (area_i + area - inter)

                newly = jnp.where((supp_i < 0.5) & (iou_row > thresh) & (col > i), 1.0, 0.0)
                supp = jnp.maximum(supp, newly)
            supp_ref[...] = supp

    keep_ref[0] = 1.0 - supp_ref[...]          # 1.0 = kept
    # TODO(synk): for pre_nms_topN >= ~2k, switch to blocked NMS (serial scan inside a
    #             128-lane tile + one vectorized suppression pass over the remainder).


def fused_iou_nms(n_valid, boxscal_flat, boxes_pk, nms_thresh, unroll=NMS_UNROLL):
    B, _, R2, _ = boxes_pk.shape
    N = R2 * 128
    keep_pk = pl.pallas_call(
        functools.partial(_iou_nms_kernel, thresh=float(nms_thresh),
                          n_boxes=N, unroll=unroll),
        out_shape=jax.ShapeDtypeStruct((B, R2, 128), jnp.float32),
        grid=(B,),
        in_specs=[
            pl.BlockSpec(memory_space=pltpu.MemorySpace.SMEM),   # n_valid  (B,) int32
            pl.BlockSpec(memory_space=pltpu.MemorySpace.SMEM),   # boxscal  (B*N*5,) f32
            pl.BlockSpec((1, 4, R2, 128), lambda b: (b, 0, 0, 0)),
        ],
        out_specs=pl.BlockSpec((1, R2, 128), lambda b: (b, 0, 0)),
        scratch_shapes=[pltpu.VMEM((R2, 128), jnp.float32)],
        compiler_params=pltpu.CompilerParams(dimension_semantics=("parallel",)),
    )(n_valid, boxscal_flat, boxes_pk)
    return keep_pk.reshape(B, N) > 0.5          # (B, N) bool kept mask


# ----------------------------------------------------------------------------
# ProposalLayer wrapper (mirrors the PyTorch module)
# ----------------------------------------------------------------------------
class ProposalLayerPallas:
    def __init__(self, feat_stride, anchor_scales=None, anchor_ratios=None, config=None):
        if config is None:
            config = CFG
        self.feat_stride = feat_stride
        self.config = config
        self._anchors_template = generate_anchor_template(
            ratios=anchor_ratios, scales=anchor_scales
        )
        self._anchors = None

    def __call__(self, inputs, img_size, offset_scale_pred, bbox_f_pred, cfg_key):
        B, _, H, W = inputs.shape
        c = self.config[cfg_key]
        pre_nms_topN = int(c["RPN_PRE_NMS_TOP_N"])
        post_nms_topN = int(c["RPN_POST_NMS_TOP_N"])
        nms_thresh = c["RPN_NMS_THRESH"]
        min_size = c["RPN_MIN_SIZE"]

        anchors_np = generate_raw_image_anchor(
            feature_height=H, feature_width=W,
            anchors_template=self._anchors_template, feat_stride=self.feat_stride,
        )
        self._anchors = jnp.asarray(anchors_np)          # (A, 4)
        A = anchors_np.shape[0]
        K = self._anchors_template.shape[0]
        assert A == H * W * K

        h_img, w_img = int(img_size[0]), int(img_size[1])
        hw_i32 = jnp.array([h_img, w_img], dtype=jnp.int32)

        # ---- layout plumbing (glue): coordinates-first, sublane-packed (R, 128) ----
        R0 = _cdiv(A, 128)
        block_r = MAX_BLOCK_R if R0 >= MAX_BLOCK_R else _round_up(R0, 8)
        R_pad = _round_up(R0, block_r)
        A_pad = R_pad * 128
        pad = A_pad - A

        anchors_p = jnp.pad(self._anchors.T, ((0, 0), (0, pad))).reshape(4, R_pad, 128)
        deltas_p = jnp.pad(
            jnp.transpose(offset_scale_pred.astype(jnp.float32), (0, 2, 1)),
            ((0, 0), (0, 0), (0, pad)),
        ).reshape(B, 4, R_pad, 128)
        scores = jnp.pad(
            jnp.reshape(bbox_f_pred.astype(jnp.float32), (B, A)),
            ((0, 0), (0, pad)), constant_values=NEG_INF,
        )
        scores_p = scores.reshape(B, R_pad, 128)

        # ---- kernel 1: decode + clip + min-size filter ----
        rois_p, mscores_p = decode_clip_filter(
            hw_i32, anchors_p, deltas_p, scores_p, min_size, block_r
        )
        rois_c = rois_p.reshape(B, 4, A_pad)
        mscores2d = mscores_p.reshape(B, A_pad)

        # ---- pre-NMS top-N (score-descending), rounded up to a lane-friendly N ----
        N = min(_round_up(min(pre_nms_topN, A_pad), 128), A_pad)
        top_vals, top_idx = lax.top_k(mscores2d, N)                                # (B, N)
        rank = jnp.arange(N, dtype=jnp.int32)[None, :]
        # valid = survived min-size filter AND within the exact pre_nms_topN budget
        valid = (top_vals > (NEG_INF * 0.5)) & (rank < pre_nms_topN)               # (B, N)
        n_valid = jnp.sum(valid, axis=1).astype(jnp.int32)                         # (B,)

        boxes_c = jnp.take_along_axis(rois_c, top_idx[:, None, :], axis=2)         # (B, 4, N)
        boxes_r = jnp.transpose(boxes_c, (0, 2, 1))                                # (B, N, 4)

        # flat SMEM copy of the sorted boxes (+ precomputed area) for scalar reads
        areas = (boxes_r[..., 2] - boxes_r[..., 0] + 1.0) * \
                (boxes_r[..., 3] - boxes_r[..., 1] + 1.0)                          # (B, N)
        boxscal = jnp.concatenate([boxes_r, areas[..., None]], axis=-1).reshape(-1)  # (B*N*5,)
        boxes_pk = boxes_c.reshape(B, 4, N // 128, 128)

        # ---- kernel 2: fused IoU + greedy NMS scan (per image, fully in-kernel) ----
        nms_keep = fused_iou_nms(n_valid, boxscal, boxes_pk, nms_thresh)           # (B, N)
        keep = nms_keep & valid

        # ---- post-NMS top-N packing (kept boxes first, already score-sorted) ----
        P = post_nms_topN
        order = jnp.argsort(jnp.logical_not(keep).astype(jnp.int32), axis=1)       # stable
        sel = order[:, :P]                                                         # (B, P)
        final_boxes = jnp.take_along_axis(boxes_r, sel[:, :, None], axis=1)        # (B, P, 4)
        final_valid = jnp.take_along_axis(keep, sel, axis=1)                       # (B, P)

        rois = final_boxes.reshape(B * P, 4)
        rois_idx = jnp.repeat(jnp.arange(B, dtype=jnp.float32), P)
        rois_valid = final_valid.reshape(B * P)

        return rois, rois_idx, self._anchors, rois_valid


# ----------------------------------------------------------------------------
if __name__ == "__main__":
    key = jax.random.PRNGKey(0)
    k1, k2, k3 = jax.random.split(key, 3)

    B, C, H, W = 2, 4, 16, 16
    feat_stride = 16
    K = 9
    A = H * W * K
    img_size = (H * feat_stride, W * feat_stride)   # (h, w) = (256, 256)

    inputs = jax.random.normal(k1, (B, C, H, W), dtype=jnp.float32)               # shape only
    offset_scale_pred = 0.1 * jax.random.normal(k2, (B, A, 4), dtype=jnp.float32)
    bbox_f_pred = jax.random.normal(k3, (B, A, 1), dtype=jnp.float32)

    layer = ProposalLayerPallas(feat_stride=feat_stride)
    rois, rois_idx, anchors, rois_valid = layer(
        inputs, img_size, offset_scale_pred, bbox_f_pred, "TEST"
    )
    jax.block_until_ready((rois, rois_idx, anchors, rois_valid))

    P = CFG["TEST"]["RPN_POST_NMS_TOP_N"]
    assert rois.shape == (B * P, 4)
    assert rois_idx.shape == (B * P,)
    assert anchors.shape == (A, 4)

    rois_np = np.asarray(rois)
    valid_np = np.asarray(rois_valid)
    assert valid_np.any(), "expected at least one valid proposal"
    v = rois_np[valid_np]
    assert np.isfinite(v).all()
    assert (v[:, 0] >= 0).all() and (v[:, 2] <= img_size[1] + 1e-3).all()
    assert (v[:, 1] >= 0).all() and (v[:, 3] <= img_size[0] + 1e-3).all()
    assert (v[:, 2] - v[:, 0] > CFG["TEST"]["RPN_MIN_SIZE"]).all()
    assert (v[:, 3] - v[:, 1] > CFG["TEST"]["RPN_MIN_SIZE"]).all()

    print("KERNEL_OK")
</pallas_src>

<mosaic_0001>
module attributes {stable_mosaic.version = 11 : i64} {
  func.func @_decode_kernel(%arg0: i32, %arg1: i32, %arg2: memref<2xi32, #tpu.memory_space<smem>>, %arg3: memref<4x24x128xf32, #tpu.memory_space<vmem>>, %arg4: memref<1x4x24x128xf32, #tpu.memory_space<vmem>>, %arg5: memref<1x24x128xf32, #tpu.memory_space<vmem>>, %arg6: memref<1x4x24x128xf32, #tpu.memory_space<vmem>>, %arg7: memref<1x24x128xf32, #tpu.memory_space<vmem>>) attributes {dimension_semantics = [#tpu.dimension_semantics<parallel>, #tpu.dimension_semantics<parallel>], iteration_bounds = array<i64: 2, 1>, scalar_prefetch = 1 : i64, scratch_operands = 0 : i64, tpu.core_type = #tpu.core_type<tc>, window_params = [{transform_indices = @transform_0, window_bounds = array<i64: 4, 24, 128>}, {transform_indices = @transform_1, window_bounds = array<i64: 1, 4, 24, 128>}, {transform_indices = @transform_2, window_bounds = array<i64: 1, 24, 128>}, {transform_indices = @transform_3, window_bounds = array<i64: 1, 4, 24, 128>}, {transform_indices = @transform_4, window_bounds = array<i64: 1, 24, 128>}]} {
    %c0 = arith.constant 0 : index
    %0 = memref.load %arg2[%c0] : memref<2xi32, #tpu.memory_space<smem>>
    %1 = arith.sitofp %0 : i32 to f32
    %c1 = arith.constant 1 : index
    %2 = memref.load %arg2[%c1] : memref<2xi32, #tpu.memory_space<smem>>
    %3 = arith.sitofp %2 : i32 to f32
    %c0_0 = arith.constant 0 : index
    %c0_1 = arith.constant 0 : index
    %c0_2 = arith.constant 0 : index
    %4 = vector.load %arg3[%c0_0, %c0_1, %c0_2] : memref<4x24x128xf32, #tpu.memory_space<vmem>>, vector<1x24x128xf32>
    %5 = vector.shape_cast %4 : vector<1x24x128xf32> to vector<24x128xf32>
    %c1_3 = arith.constant 1 : index
    %c0_4 = arith.constant 0 : index
    %c0_5 = arith.constant 0 : index
    %6 = vector.load %arg3[%c1_3, %c0_4, %c0_5] : memref<4x24x128xf32, #tpu.memory_space<vmem>>, vector<1x24x128xf32>
    %7 = vector.shape_cast %6 : vector<1x24x128xf32> to vector<24x128xf32>
    %c2 = arith.constant 2 : index
    %c0_6 = arith.constant 0 : index
    %c0_7 = arith.constant 0 : index
    %8 = vector.load %arg3[%c2, %c0_6, %c0_7] : memref<4x24x128xf32, #tpu.memory_space<vmem>>, vector<1x24x128xf32>
    %9 = vector.shape_cast %8 : vector<1x24x128xf32> to vector<24x128xf32>
    %c3 = arith.constant 3 : index
    %c0_8 = arith.constant 0 : index
    %c0_9 = arith.constant 0 : index
    %10 = vector.load %arg3[%c3, %c0_8, %c0_9] : memref<4x24x128xf32, #tpu.memory_space<vmem>>, vector<1x24x128xf32>
    %11 = vector.shape_cast %10 : vector<1x24x128xf32> to vector<24x128xf32>
    %12 = arith.subf %9, %5 : vector<24x128xf32>
    %cst = arith.constant 1.000000e+00 : f32
    %13 = vector.broadcast %cst : f32 to vector<24x128xf32>
    %14 = arith.addf %12, %13 : vector<24x128xf32>
    %15 = arith.subf %11, %7 : vector<24x128xf32>
    %cst_10 = arith.constant 1.000000e+00 : f32
    %16 = vector.broadcast %cst_10 : f32 to vector<24x128xf32>
    %17 = arith.addf %15, %16 : vector<24x128xf32>
    %cst_11 = arith.constant 5.000000e-01 : f32
    %18 = vector.broadcast %cst_11 : f32 to vector<24x128xf32>
    %19 = arith.mulf %18, %14 : vector<24x128xf32>
    %20 = arith.addf %5, %19 : vector<24x128xf32>
    %cst_12 = arith.constant 5.000000e-01 : f32
    %21 = vector.broadcast %cst_12 : f32 to vector<24x128xf32>
    %22 = arith.mulf %21, %17 : vector<24x128xf32>
    %23 = arith.addf %7, %22 : vector<24x128xf32>
    %c0_13 = arith.constant 0 : index
    %c0_14 = arith.constant 0 : index
    %c0_15 = arith.constant 0 : index
    %c0_16 = arith.constant 0 : index
    %24 = vector.load %arg4[%c0_13, %c0_14, %c0_15, %c0_16] : memref<1x4x24x128xf32, #tpu.memory_space<vmem>>, vector<1x1x24x128xf32>
    %25 = vector.shape_cast %24 : vector<1x1x24x128xf32> to vector<24x128xf32>
    %c0_17 = arith.constant 0 : index
    %c1_18 = arith.constant 1 : index
    %c0_19 = arith.constant 0 : index
    %c0_20 = arith.constant 0 : index
    %26 = vector.load %arg4[%c0_17, %c1_18, %c0_19, %c0_20] : memref<1x4x24x128xf32, #tpu.memory_space<vmem>>, vector<1x1x24x128xf32>
    %27 = vector.shape_cast %26 : vector<1x1x24x128xf32> to vector<24x128xf32>
    %c0_21 = arith.constant 0 : index
    %c2_22 = arith.constant 2 : index
    %c0_23 = arith.constant 0 : index
    %c0_24 = arith.constant 0 : index
    %28 = vector.load %arg4[%c0_21, %c2_22, %c0_23, %c0_24] : memref<1x4x24x128xf32, #tpu.memory_space<vmem>>, vector<1x1x24x128xf32>
    %29 = vector.shape_cast %28 : vector<1x1x24x128xf32> to vector<24x128xf32>
    %c0_25 = arith.constant 0 : index
    %c3_26 = arith.constant 3 : index
    %c0_27 = arith.constant 0 : index
    %c0_28 = arith.constant 0 : index
    %30 = vector.load %arg4[%c0_25, %c3_26, %c0_27, %c0_28] : memref<1x4x24x128xf32, #tpu.memory_space<vmem>>, vector<1x1x24x128xf32>
    %31 = vector.shape_cast %30 : vector<1x1x24x128xf32> to vector<24x128xf32>
    %32 = arith.mulf %25, %14 : vector<24x128xf32>
    %33 = arith.addf %32, %20 : vector<24x128xf32>
    %34 = arith.mulf %27, %17 : vector<24x128xf32>
    %35 = arith.addf %34, %23 : vector<24x128xf32>
    %36 = math.exp %29 : vector<24x128xf32>
    %37 = arith.mulf %36, %14 : vector<24x128xf32>
    %38 = math.exp %31 : vector<24x128xf32>
    %39 = arith.mulf %38, %17 : vector<24x128xf32>
    %cst_29 = arith.constant 5.000000e-01 : f32
    %40 = vector.broadcast %cst_29 : f32 to vector<24x128xf32>
    %41 = arith.mulf %40, %37 : vector<24x128xf32>
    %42 = arith.subf %33, %41 : vector<24x128xf32>
    %cst_30 = arith.constant 0.000000e+00 : f32
    %43 = vector.broadcast %cst_30 : f32 to vector<24x128xf32>
    %44 = arith.maximumf %43, %42 : vector<24x128xf32>
    %45 = vector.broadcast %3 : f32 to vector<24x128xf32>
    %46 = arith.minimumf %45, %44 : vector<24x128xf32>
    %cst_31 = arith.constant 5.000000e-01 : f32
    %47 = vector.broadcast %cst_31 : f32 to vector<24x128xf32>
    %48 = arith.mulf %47, %39 : vector<24x128xf32>
    %49 = arith.subf %35, %48 : vector<24x128xf32>
    %cst_32 = arith.constant 0.000000e+00 : f32
    %50 = vector.broadcast %cst_32 : f32 to vector<24x128xf32>
    %51 = arith.maximumf %50, %49 : vector<24x128xf32>
    %52 = vector.broadcast %1 : f32 to vector<24x128xf32>
    %53 = arith.minimumf %52, %51 : vector<24x128xf32>
    %cst_33 = arith.constant 5.000000e-01 : f32
    %54 = vector.broadcast %cst_33 : f32 to vector<24x128xf32>
    %55 = arith.mulf %54, %37 : vector<24x128xf32>
    %56 = arith.addf %33, %55 : vector<24x128xf32>
    %cst_34 = arith.constant 0.000000e+00 : f32
    %57 = vector.broadcast %cst_34 : f32 to vector<24x128xf32>
    %58 = arith.maximumf %57, %56 : vector<24x128xf32>
    %59 = vector.broadcast %3 : f32 to vector<24x128xf32>
    %60 = arith.minimumf %59, %58 : vector<24x128xf32>
    %cst_35 = arith.constant 5.000000e-01 : f32
    %61 = vector.broadcast %cst_35 : f32 to vector<24x128xf32>
    %62 = arith.mulf %61, %39 : vector<24x128xf32>
    %63 = arith.addf %35, %62 : vector<24x128xf32>
    %cst_36 = arith.constant 0.000000e+00 : f32
    %64 = vector.broadcast %cst_36 : f32 to vector<24x128xf32>
    %65 = arith.maximumf %64, %63 : vector<24x128xf32>
    %66 = vector.broadcast %1 : f32 to vector<24x128xf32>
    %67 = arith.minimumf %66, %65 : vector<24x128xf32>
    %68 = arith.subf %67, %53 : vector<24x128xf32>
    %cst_37 = arith.constant 4.000000e+00 : f32
    %69 = vector.broadcast %cst_37 : f32 to vector<24x128xf32>
    %70 = arith.cmpf ogt, %68, %69 : vector<24x128xf32>
    %71 = arith.subf %60, %46 : vector<24x128xf32>
    %cst_38 = arith.constant 4.000000e+00 : f32
    %72 = vector.broadcast %cst_38 : f32 to vector<24x128xf32>
    %73 = arith.cmpf ogt, %71, %72 : vector<24x128xf32>
    %74 = arith.andi %70, %73 : vector<24x128xi1>
    %c0_39 = arith.constant 0 : index
    %c0_40 = arith.constant 0 : index
    %c0_41 = arith.constant 0 : index
    %c0_42 = arith.constant 0 : index
    %75 = vector.load %arg6[%c0_39, %c0_40, %c0_41, %c0_42] : memref<1x4x24x128xf32, #tpu.memory_space<vmem>>, vector<1x1x24x128xf32>
    %76 = vector.shape_cast %75 : vector<1x1x24x128xf32> to vector<24x128xf32>
    %77 = vector.shape_cast %46 : vector<24x128xf32> to vector<1x1x24x128xf32>
    tpu.vector_store %arg6[%c0_39, %c0_40, %c0_41, %c0_42], %77 {strides = array<i32>} : memref<1x4x24x128xf32, #tpu.memory_space<vmem>>, vector<1x1x24x128xf32>,
    %c0_43 = arith.constant 0 : index
    %c1_44 = arith.constant 1 : index
    %c0_45 = arith.constant 0 : index
    %c0_46 = arith.constant 0 : index
    %78 = vector.load %arg6[%c0_43, %c1_44, %c0_45, %c0_46] : memref<1x4x24x128xf32, #tpu.memory_space<vmem>>, vector<1x1x24x128xf32>
    %79 = vector.shape_cast %78 : vector<1x1x24x128xf32> to vector<24x128xf32>
    %80 = vector.shape_cast %53 : vector<24x128xf32> to vector<1x1x24x128xf32>
    tpu.vector_store %arg6[%c0_43, %c1_44, %c0_45, %c0_46], %80 {strides = array<i32>} : memref<1x4x24x128xf32, #tpu.memory_space<vmem>>, vector<1x1x24x128xf32>,
    %c0_47 = arith.constant 0 : index
    %c2_48 = arith.constant 2 : index
    %c0_49 = arith.constant 0 : index
    %c0_50 = arith.constant 0 : index
    %81 = vector.load %arg6[%c0_47, %c2_48, %c0_49, %c0_50] : memref<1x4x24x128xf32, #tpu.memory_space<vmem>>, vector<1x1x24x128xf32>
    %82 = vector.shape_cast %81 : vector<1x1x24x128xf32> to vector<24x128xf32>
    %83 = vector.shape_cast %60 : vector<24x128xf32> to vector<1x1x24x128xf32>
    tpu.vector_store %arg6[%c0_47, %c2_48, %c0_49, %c0_50], %83 {strides = array<i32>} : memref<1x4x24x128xf32, #tpu.memory_space<vmem>>, vector<1x1x24x128xf32>,
    %c0_51 = arith.constant 0 : index
    %c3_52 = arith.constant 3 : index
    %c0_53 = arith.constant 0 : index
    %c0_54 = arith.constant 0 : index
    %84 = vector.load %arg6[%c0_51, %c3_52, %c0_53, %c0_54] : memref<1x4x24x128xf32, #tpu.memory_space<vmem>>, vector<1x1x24x128xf32>
    %85 = vector.shape_cast %84 : vector<1x1x24x128xf32> to vector<24x128xf32>
    %86 = vector.shape_cast %67 : vector<24x128xf32> to vector<1x1x24x128xf32>
    tpu.vector_store %arg6[%c0_51, %c3_52, %c0_53, %c0_54], %86 {strides = array<i32>} : memref<1x4x24x128xf32, #tpu.memory_space<vmem>>, vector<1x1x24x128xf32>,
    %c0_55 = arith.constant 0 : index
    %c0_56 = arith.constant 0 : index
    %c0_57 = arith.constant 0 : index
    %87 = vector.load %arg5[%c0_55, %c0_56, %c0_57] : memref<1x24x128xf32, #tpu.memory_space<vmem>>, vector<1x24x128xf32>
    %88 = vector.shape_cast %87 : vector<1x24x128xf32> to vector<24x128xf32>
    %cst_58 = arith.constant -1.000000e+30 : f32
    %89 = vector.broadcast %cst_58 : f32 to vector<24x128xf32>
    %90 = arith.select %74, %88, %89 : vector<24x128xi1>, vector<24x128xf32>
    %c0_59 = arith.constant 0 : index
    %c0_60 = arith.constant 0 : index
    %c0_61 = arith.constant 0 : index
    %91 = vector.load %arg7[%c0_59, %c0_60, %c0_61] : memref<1x24x128xf32, #tpu.memory_space<vmem>>, vector<1x24x128xf32>
    %92 = vector.shape_cast %91 : vector<1x24x128xf32> to vector<24x128xf32>
    %93 = vector.shape_cast %90 : vector<24x128xf32> to vector<1x24x128xf32>
    tpu.vector_store %arg7[%c0_59, %c0_60, %c0_61], %93 {strides = array<i32>} : memref<1x24x128xf32, #tpu.memory_space<vmem>>, vector<1x24x128xf32>,
    return
  }
  func.func @transform_0(%arg0: i32, %arg1: i32, %arg2: memref<2xi32, #tpu.memory_space<smem>>) -> (i32, i32, i32) {
    %c0_i32 = arith.constant 0 : i32
    %c0_i32_0 = arith.constant 0 : i32
    %c0_i32_1 = arith.constant 0 : i32
    return %c0_i32, %arg1, %c0_i32_0 : i32, i32, i32
  }
  func.func @transform_1(%arg0: i32, %arg1: i32, %arg2: memref<2xi32, #tpu.memory_space<smem>>) -> (i32, i32, i32, i32) {
    %c0_i32 = arith.constant 0 : i32
    %c0_i32_0 = arith.constant 0 : i32
    %c0_i32_1 = arith.constant 0 : i32
    return %arg0, %c0_i32, %arg1, %c0_i32_0 : i32, i32, i32, i32
  }
  func.func @transform_2(%arg0: i32, %arg1: i32, %arg2: memref<2xi32, #tpu.memory_space<smem>>) -> (i32, i32, i32) {
    %c0_i32 = arith.constant 0 : i32
    %c0_i32_0 = arith.constant 0 : i32
    return %arg0, %arg1, %c0_i32 : i32, i32, i32
  }
  func.func @transform_3(%arg0: i32, %arg1: i32, %arg2: memref<2xi32, #tpu.memory_space<smem>>) -> (i32, i32, i32, i32) {
    %c0_i32 = arith.constant 0 : i32
    %c0_i32_0 = arith.constant 0 : i32
    %c0_i32_1 = arith.constant 0 : i32
    return %arg0, %c0_i32, %arg1, %c0_i32_0 : i32, i32, i32, i32
  }
  func.func @transform_4(%arg0: i32, %arg1: i32, %arg2: memref<2xi32, #tpu.memory_space<smem>>) -> (i32, i32, i32) {
    %c0_i32 = arith.constant 0 : i32
    %c0_i32_0 = arith.constant 0 : i32
    return %arg0, %arg1, %c0_i32 : i32, i32, i32
  }
}

</mosaic_0001>

<bundles_post_ra>
// kernel: tpu_custom_call.1
= control target key start
LH: loop header
LB: loop body
LE: loop exit
PB: predicated region body
PF: predicated region fallthrough
CT: control target
= control target key end

     0   :  { %s1496_s0 = inlined_call_operand.hbm [shape: s32[2], index: 0, kind: input, shape index: {}]   ;;  %s1497_s1 = inlined_call_operand.hbm [shape: f32[4,24,128], index: 1, kind: input, shape index: {}]   ;;  %s1498_s2 = inlined_call_operand.hbm [shape: f32[2,4,24,128], index: 2, kind: input, shape index: {}]   ;;  %s1499_s3 = inlined_call_operand.hbm [shape: f32[2,24,128], index: 3, kind: input, shape index: {}]   ;;  %s1500_s4 = inlined_call_operand.hbm [shape: f32[2,4,24,128], index: 4, kind: output, shape index: {0}]   ;;  %s1501_s5 = inlined_call_operand.hbm [shape: f32[2,24,128], index: 5, kind: output, shape index: {1}]  }
   0x1   :  { %1510 = sst [smem:[#allocation18_spill]] %s1498_s2  ;;  %s830_s20 = scalar_lea.hbm %s1496_s0, 16 }
   0x2   :  { %1511 = sst [smem:[#allocation19_spill]] %s1499_s3  ;;  %p831_p0 = scmp.ne.s32.totalorder %s1496_s0, %s830_s20 }
   0x3   :  { %p834_p1 = scmp.lt.u32.totalorder %s830_s20, %s1496_s0 }
   0x5   :  { %p836_p2 = pnand %p834_p1, %p831_p0 }
   0x7   :  { %839 = shalt.err (!%p836_p2)  }
   0x8   :  { %s1050_s25 = smov [#allocation3]  }
   0x9   :  { %12 = dma.hbm_to_smem %s1496_s0, 16, %s1050_s25, [#allocation2] }
   0xa   :  { %1008 = dma.done.wait [#allocation2], 16 }
   0xb   :  { %1009 = vsyncadd [#allocation2], 4294967280 }
   0xc   :  { %14 = sfence }
   0xd   :  { %15 = vsyncpa [#allocation5], 0 }
   0xe   :  { %16 = vsyncpa [#allocation8], 0 }
   0xf   :  { %18 = vsyncpa [#allocation8 + $0x1], 0 }
  0x10   :  { %19 = vsyncpa [#allocation6], 0 }
  0x11   :  { %21 = vsyncpa [#allocation6 + $0x1], 0 }
  0x12   :  { %22 = vsyncpa [#allocation12], 0 }
  0x13   :  { %24 = vsyncpa [#allocation12 + $0x1], 0  ;;  %s1102_s28 = smov 0   ;;  %s1104_s29 = smov 0  }
  0x14   :  { %s1106_s30 = smov 0   ;;  %s1108_s6 = smov 0  }
  0x15   :  { %s1110_s7 = smov 0   ;;  %s1112_s0 = smov 0  }
  0x16 LB: > { %s42_s8 = sadd.s32 1, %s1044_s7  ;;  %s77_s9 = sadd.s32 1, %s1036_s30  ;;  %s1048_s0 = sphi %s1112_s0, %s30_s0   ;;  %s1044_s7 = sphi %s1110_s7, %s1541_s7   ;;  %s1040_s6 = sphi %s1108_s6, %s1540_s6   ;;  %s1036_s30 = sphi %s1106_s30, %s1539_s30   ;;  %s1032_s29 = sphi %s1104_s29, %s1538_s29   ;;  %s1028_s28 = sphi %s1102_s28, %s1537_s28  }
  0x17   : > { %p44_p3 = scmp.ge.s32.totalorder %s42_s8, 2  ;;  %p84_p4 = scmp.ne.s32.totalorder %s1036_s30, %s1032_s29 }
  0x18   : > { %p85_p5 = scmp.eq.s32.totalorder %s1048_s0, 0  ;;  %p761_p9 = scmp.lt.s32.totalorder %s1048_s0, 2 }
  0x19   : > { %s1543_s8 = smov (%p44_p3, %s42_s8), 0  ;;  %s214_s11 = sand.u32 1, %s1048_s0  }
  0x1a   : > { %p86_p6 = por %p85_p5, %p84_p4  ;;  %s72_s10 = ssub.s32 %s1044_s7, %s1543_s8 }
  0x1b   : > { %p75_p8 = scmp.eq.s32.totalorder %s72_s10, 0  ;;  %s216_s12 = sand.u32 1, %s1036_s30  }
  0x1c   : > { %s722_s14 = smul.u32 96, %s216_s12  ;;  %p1152_p10 = pnand %p761_p9, %p86_p6 }
  0x1d   : > { %s1149_s13 = scalar_select %p75_p8, %s1036_s30, %s77_s9  }
  0x1e   : > { %s723_s15 = smul.u32 1536, %s1044_s7  ;;  %s1513_s2 = sld [smem:[#allocation18_spill]] }
  0x1f   : > { %s1156_s17 = smul.u32 24, %s216_s12  ;;  %s218_s21 = scalar_lea.vmem [#allocation7], %s722_s14 }
  0x20   : > { %s227_s22 = sshll.u32 %s218_s21, 4  ;;  %s1165_s23 = scalar_lea.sflag [#allocation8], %s214_s11  ;;  %s1163_s22 = int_to_ptr.vmem [resolvable:$true] %s227_s22 }
  0x21   : > { %p842_p12 = pneg %p1152_p10 }
  0x24   : > { %s1161_s20 = scalar_lea.hbm %s1513_s2, %s723_s15  ;;  %s845_s27 = scalar_lea.hbm %s1513_s2, 3072 }
  0x25   : > { %s840_s24 = scalar_lea.hbm %s1161_s20, 1536  ;;  %p846_p1 = scmp.lt.u32.totalorder %s1161_s20, %s1513_s2 }
  0x26   : > { %p841_p11 = scmp.ne.s32.totalorder %s1161_s20, %s840_s24  ;;  %p847_p2 = scmp.lt.u32.totalorder %s845_s27, %s840_s24 }
  0x27   : > { %p849_p5 = scmp.lt.u32.totalorder %s840_s24, %s1161_s20 }
  0x28   : > { %p843_p13 = pnand %p842_p12, %p841_p11  ;;  %p848_p3 = por %p847_p2, %p846_p1 }
  0x2a   : > { %p844_p0 = pneg %p843_p13  ;;  %p850_p6 = por %p849_p5, %p848_p3 }
  0x2c   : > { %p851_p8 = pnand %p850_p6, %p844_p0 }
  0x2e   : > { %854 = shalt.err (!%p851_p8)
}
  0x2f   : > { %s855_s11 = scalar_lea.vmem %s1163_s22, 1536  ;;  %s1051_s12 = smov [#allocation7]  }
  0x30   : > { %p856_p9 = scmp.ne.s32.totalorder %s1163_s22, %s855_s11  ;;  %s860_s14 = sshll.u32 %s1051_s12, 4  ;;  %s861_s14 = int_to_ptr.vmem [resolvable:$false] %s860_s14 }
  0x31   : > { %s862_s15 = scalar_lea.vmem %s861_s14, 3072  ;;  %p863_p7 = scmp.lt.s32.totalorder %s1163_s22, %s861_s14 }
  0x32   : > { %p858_p11 = pnand %p856_p9, %p842_p12  ;;  %p864_p1 = scmp.lt.s32.totalorder %s862_s15, %s855_s11 }
  0x34   : > { %p859_p13 = pneg %p858_p11  ;;  %p865_p2 = por %p864_p1, %p863_p7 }
  0x36   : > { %p866_p3 = pnand %p865_p2, %p859_p13 }
  0x38   : > { %869 = shalt.err (!%p866_p3)
}
  0x39   : > { %s1502_s18 = smov 128   ;;  %s1506_s19 = smov 8  }
  0x3a   : > { %749 = dma.hbm_to_vmem [thread:$0]  (!%p1152_p10), %s1161_s20, 1536, %s1163_s22, %s1165_s23, %s1502_s18, %s1502_s18, %s1506_s19  }
  0x3b   : > { %s1197_s21 = sadd.s32 4294967295, %s1048_s0   ;;  %s691_s24 = sadd.s32 4294967294, %s1048_s0  }
  0x3c   : > { %p90_p7 = scmp.ne.s32.totalorder %s1032_s29, %s1028_s28  ;;  %p1504_p0 = scmp.eq.s32.totalorder %s1197_s21, 0 }
  0x3d   : > { %p144_p5 = scmp.eq.s32.totalorder %s1197_s21, 1  ;;  %p150_p6 = scmp.eq.s32.totalorder %s691_s24, 1 }
  0x3e   : > { %p692_p8 = scmp.ge.s32.totalorder %s1048_s0, 1  ;;  %p1207_p9 = por %p1504_p0, %p90_p7 }
  0x3f   : > { %p1214_p11 = por %p144_p5, %p84_p4  ;;  %p1218_p13 = por %p150_p6, %p90_p7 }
  0x40   : > { %s1514_s25 = scalar_select %p1207_p9, 1, 0 }
  0x41   : > { %s1515_s20 = scalar_select %p1214_p11, 1, 0 }
  0x42   : > { %s1516_s22 = scalar_select %p1218_p13, 1, 0 }
  0x43   : > { %p185_p1 = scmp.lt.s32.totalorder %s1048_s0, 3  ;;  %s1054_s27 = smov [#allocation4]  }
  0x44   : > { %s200_s9 = sshll.u32 %s1054_s27, 4  ;;  %s725_s10 = smul.u32 384, %s1044_s7  ;;  %s1238_s9 = int_to_ptr.vmem [resolvable:$true] %s200_s9 }
  0x45   : > { %p1223_p2 = pnand %p692_p8, %p185_p1  ;;  %s241_s11 = scalar_lea.vmem [#allocation9], %s1156_s17 }
  0x46   : > { %s250_s12 = sshll.u32 %s241_s11, 4  ;;  %s1518_s3 = sld [smem:[#allocation19_spill]]  ;;  %s1236_s12 = int_to_ptr.vmem [resolvable:$true] %s250_s12 }
  0x47   : > { %s1517_s26 = scalar_select %p1223_p2, 1, 0 }
  0x48   : > { %p742_p3 = pneg %p1223_p2 }
  0x4a   : > { %p1242_p4 = pnand %p742_p3, %p1504_p0 }
  0x4c   : > { %s1234_s24 = scalar_lea.hbm %s1518_s3, %s725_s10  ;;  %s875_s14 = scalar_lea.hbm %s1518_s3, 768 }
  0x4d   : > { %s870_s17 = scalar_lea.hbm %s1234_s24, 384  ;;  %p876_p8 = scmp.lt.u32.totalorder %s1234_s24, %s1518_s3 }
  0x4e   : > { %p871_p7 = scmp.ne.s32.totalorder %s1234_s24, %s870_s17  ;;  %p877_p1 = scmp.lt.u32.totalorder %s875_s14, %s870_s17 }
  0x4f   : > { %p879_p3 = scmp.lt.u32.totalorder %s870_s17, %s1234_s24 }
  0x50   : > { %p873_p5 = pnand %p871_p7, %p842_p12  ;;  %p878_p13 = por %p877_p1, %p876_p8 }
  0x52   : > { %p874_p6 = pneg %p873_p5  ;;  %p880_p0 = por %p879_p3, %p878_p13 }
  0x54   : > { %p881_p11 = pnand %p880_p0, %p874_p6 }
  0x56   : > { %884 = shalt.err (!%p881_p11)
}
  0x57   : > { %s885_s19 = scalar_lea.vmem %s1236_s12, 384  ;;  %s1055_s10 = smov [#allocation9]  }
  0x58   : > { %p886_p7 = scmp.ne.s32.totalorder %s1236_s12, %s885_s19  ;;  %s890_s11 = sshll.u32 %s1055_s10, 4  ;;  %s891_s11 = int_to_ptr.vmem [resolvable:$false] %s890_s11 }
  0x59   : > { %s892_s18 = scalar_lea.vmem %s891_s11, 768  ;;  %p893_p2 = scmp.lt.s32.totalorder %s1236_s12, %s891_s11 }
  0x5a   : > { %p888_p5 = pnand %p886_p7, %p842_p12  ;;  %p894_p8 = scmp.lt.s32.totalorder %s892_s18, %s885_s19 }
  0x5c   : > { %p889_p9 = pneg %p888_p5  ;;  %p895_p1 = por %p894_p8, %p893_p2 }
  0x5e   : > { %p896_p13 = pnand %p895_p1, %p889_p9 }
  0x60   : > { %899 = shalt.err (!%p896_p13)
}
  0x61   : > { %s1520_s17 = smov 8   ;;  %s1521_s14 = smov 128  }
  0x62   : > { %752 = dma.hbm_to_vmem [thread:$0]  (!%p1152_p10), %s1234_s24, 384, %s1236_s12, %s1165_s23, %s1521_s14, %s1521_s14, %s1520_s17  }
  0x63   : > { %s900_s10 = scalar_lea.hbm %s1497_s1, 1536  ;;  %p902_p0 = pneg %p1242_p4 }
  0x64   : > { %p901_p12 = scmp.ne.s32.totalorder %s1497_s1, %s900_s10  ;;  %p907_p2 = scmp.lt.u32.totalorder %s900_s10, %s1497_s1 }
  0x66   : > { %p903_p9 = pnand %p902_p0, %p901_p12 }
  0x68   : > { %p904_p11 = pneg %p903_p9 }
  0x6a   : > { %p909_p6 = pnand %p907_p2, %p904_p11 }
  0x6c   : > { %912 = shalt.err (!%p909_p6)
}
  0x6d   : > { %s913_s23 = scalar_lea.vmem %s1238_s9, 1536  ;;  %p921_p5 = scmp.lt.s32.totalorder %s1238_s9, %s1238_s9 }
  0x6e   : > { %p914_p10 = scmp.ne.s32.totalorder %s1238_s9, %s913_s23  ;;  %p922_p8 = scmp.lt.s32.totalorder %s913_s23, %s913_s23 }
  0x70   : > { %p916_p3 = pnand %p914_p10, %p902_p0  ;;  %p923_p1 = por %p922_p8, %p921_p5 }
  0x72   : > { %p917_p7 = pneg %p916_p3 }
  0x74   : > { %p924_p13 = pnand %p923_p1, %p917_p7 }
  0x76   : > { %927 = shalt.err (!%p924_p13)
}
  0x77   : > { %745 = dma.hbm_to_vmem [thread:$0]  (!%p1242_p4), %s1497_s1, 1536, %s1238_s9, [#allocation5], %s1521_s14, %s1521_s14, %s1520_s17  }
  0x78   : > { %p1522_p12 = scmp.ne.s32.totalorder %s1517_s26, 0 }
  0x79   : > { %p1523_p0 = scmp.eq.s32.totalorder (!%p1522_p12), %s1197_s21, 0 }
  0x7a   : > { %262 = sbr.rel (%p1522_p12) target bundleno = 208 (0xd0), region = 32 }
  0x81   : > { %1011 = dma.done.wait (%p1523_p0), [#allocation5], 1536   ;;  %p1524_p9 = pmov %p1523_p0 }
  0x82   : > { %s268_s12 = sand.u32 1, %s1197_s21   ;;  %s1305_s24 = sand.u32 1, %s1032_s29  }
  0x83   : > { %1013 = vsyncadd (%p1524_p9), [#allocation5], 4294965760  ;;  %s726_s27 = smul.u32 96, %s1305_s24  ;;  %s269_s18 = scalar_lea.sflag [#allocation8], %s268_s12 }
  0x84   : > { %p1525_p4 = scmp.ne.s32.totalorder %s1514_s25, 0 }
  0x85   : > { %s1310_s9 = scalar_lea.vmem [#allocation7], %s726_s27 }
  0x86   : > { %1015 = dma.done.wait (%p1525_p4), %s269_s18, 1920  }
  0x87   : > { %1017 = vsyncadd (%p1525_p4), %s269_s18, 4294965376  ;;  %v325_v0 = vld [vmem:[#allocation4] sm:$0xff]  ;;  %v333_v1 = vld [vmem:[#allocation4 + $0x30] sm:$0xff]  ;;  %s1319_s21 = sld [smem:[#allocation3 + $0x1]]  ;;  %s1323_s25 = sld [smem:[#allocation3]] }
  0x88   : > { %v340_v2 = vsub.f32 %v333_v1, %v325_v0  ;;  %v703_v3 = vld [vmem:[%s1310_s9 + $0x30] sm:$0xff]  ;;  %v326_v4 = vld [vmem:[#allocation4 + $0x8] sm:$0xff]  ;;  %v334_v5 = vld [vmem:[#allocation4 + $0x38] sm:$0xff]  ;;  %s1338_s14 = scalar_lea.vmem [#allocation10], %s726_s27  ;;  %s727_s15 = smul.u32 24, %s1305_s24 }
  0x89   : > { %v391_v6 = vmul.f32 1.442695, %v703_v3  ;;  %v341_v7 = vsub.f32 %v334_v5, %v326_v4  ;;  %v704_v8 = vld [vmem:[%s1310_s9 + $0x38] sm:$0xff]  ;;  %v327_v9 = vld [vmem:[#allocation4 + $0x10] sm:$0xff]  ;;  %v335_v12 = vld [vmem:[#allocation4 + $0x40] sm:$0xff]  ;;  %s728_s10 = smul.u32 1536, %s1040_s6 }
  0x8a   : > { %v343_v10 = vadd.f32 1.0, %v340_v2  ;;  %v393_v11 = vmul.f32 1.442695, %v704_v8  ;;  %v705_v13 = vld [vmem:[%s1310_s9 + $0x40] sm:$0xff]  ;;  %v342_v15 = vsub.f32 %v335_v12, %v327_v9  ;;  %v329_v17 = vld [vmem:[#allocation4 + $0x18] sm:$0xff]  ;;  %v337_v18 = vld [vmem:[#allocation4 + $0x48] sm:$0xff] }
  0x8b   : > { %818 = vpow2.f32 %v391_v6  ;;  %v344_v14 = vadd.f32 1.0, %v341_v7  ;;  %v395_v16 = vmul.f32 1.442695, %v705_v13  ;;  %v346_v19 = vsub.f32 %v337_v18, %v329_v17  ;;  %v706_v20 = vld [vmem:[%s1310_s9 + $0x48] sm:$0xff]  ;;  %v330_v21 = vld [vmem:[#allocation4 + $0x20] sm:$0xff]  ;;  %v338_v22 = vld [vmem:[#allocation4 + $0x50] sm:$0xff]  ;;  %s1363_s23 = scalar_lea.hbm %s1500_s4, %s728_s10 }
  0x8c   : > { %820 = vpow2.f32 %v393_v11  ;;  %v352_v23 = vmul.f32 0.5, %v343_v10  ;;  %v364_v24 = vld [vmem:[%s1310_s9] sm:$0xff]  ;;  %v345_v25 = vadd.f32 1.0, %v342_v15  ;;  %v707_v26 = vld [vmem:[%s1310_s9 + $0x50] sm:$0xff]  ;;  %v400_v28 = vmul.f32 1.442695, %v706_v20 }
  0x8d   : > { %822 = vpow2.f32 %v395_v16  ;;  %v349_v27 = vadd.f32 1.0, %v346_v19  ;;  %v347_v29 = vsub.f32 %v338_v22, %v330_v21  ;;  %v353_v30 = vmul.f32 0.5, %v344_v14  ;;  %v331_v32 = vld [vmem:[#allocation4 + $0x28] sm:$0xff]  ;;  %v339_v33 = vld [vmem:[#allocation4 + $0x58] sm:$0xff]  ;;  %v366_v39 = vld [vmem:[%s1310_s9 + $0x10] sm:$0xff]  ;;  %s324_s26 = scvt.s32.f32 %s1319_s21  ;;  %s322_s17 = scvt.s32.f32 %s1323_s25 }
  0x8e   : > { %v402_v31 = vmul.f32 1.442695, %v707_v26  ;;  %v708_v34 = vld [vmem:[%s1310_s9 + $0x58] sm:$0xff]  ;;  %v379_v35 = vmul.f32 %v364_v24, %v343_v10  ;;  %v365_v36 = vld [vmem:[%s1310_s9 + $0x8] sm:$0xff]  ;;  %v354_v37 = vmul.f32 0.5, %v345_v25  ;;  %824 = vpow2.f32 %v400_v28  ;;  %v701_v48 = vld [vmem:[%s1310_s9 + $0x20] sm:$0xff] }
  0x8f   : > { %v355_v38 = vadd.f32 %v352_v23, %v325_v0  ;;  %v358_v40 = vmul.f32 0.5, %v349_v27  ;;  %v350_v41 = vadd.f32 1.0, %v347_v29  ;;  %v700_v42 = vld [vmem:[%s1310_s9 + $0x18] sm:$0xff]  ;;  %v348_v43 = vsub.f32 %v339_v33, %v331_v32  ;;  %v702_v52 = vld [vmem:[%s1310_s9 + $0x28] sm:$0xff]  ;;  %s513_s11 = sshll.u32 %s1338_s14, 4  ;;  %s281_s2 = scalar_lea.vmem [#allocation9], %s727_s15  ;;  %s1374_s11 = int_to_ptr.vmem [resolvable:$true] %s513_s11 }
  0x90   : > { %826 = vpow2.f32 %v402_v31  ;;  %v404_v44 = vmul.f32 1.442695, %v708_v34  ;;  %v356_v45 = vadd.f32 %v353_v30, %v326_v4  ;;  %v380_v46 = vmul.f32 %v365_v36, %v344_v14  ;;  %s1378_s3 = scalar_lea.vmem [#allocation11], %s727_s15  ;;  %s729_s27 = smul.u32 384, %s1040_s6 }
  0x91   : > { %v359_v47 = vmul.f32 0.5, %v350_v41  ;;  %v357_v49 = vadd.f32 %v354_v37, %v327_v9  ;;  %v381_v50 = vmul.f32 %v366_v39, %v345_v25  ;;  %v351_v51 = vadd.f32 1.0, %v348_v43  ;;  %s531_s12 = sshll.u32 %s1378_s3, 4  ;;  %s493_s18 = scalar_lea.sflag [#allocation6], %s1305_s24  ;;  %s1428_s12 = int_to_ptr.vmem [resolvable:$true] %s531_s12 }
  0x92   : > { %828 = vpow2.f32 %v404_v44  ;;  %v382_v54 = vadd.f32 %v379_v35, %v355_v38  ;;  %v361_v55 = vadd.f32 %v358_v40, %v329_v17  ;;  %v385_v56 = vmul.f32 %v700_v42, %v349_v27  ;;  %s928_s9 = scalar_lea.vmem %s1374_s11, 1536  ;;  %p1534_p2 = scmp.ne.s32.totalorder %s1515_s20, 0 }
  0x93   : > { %v362_v59 = vadd.f32 %v359_v47, %v330_v21  ;;  %v386_v60 = vmul.f32 %v701_v48, %v350_v41  ;;  %v360_v61 = vmul.f32 0.5, %v351_v51  ;;  %v383_v63 = vadd.f32 %v380_v46, %v356_v45  ;;  %p929_p11 = scmp.ne.s32.totalorder %s1374_s11, %s928_s9  ;;  %s1056_s21 = smov [#allocation10]  }
  0x94   : > { %v387_v1 = vmul.f32 %v702_v52, %v351_v51  ;;  %v384_v3 = vadd.f32 %v381_v50, %v357_v49  ;;  %v418_v6 = vstv %s324_s26  ;;  %v388_v8 = vadd.f32 %v385_v56, %v361_v55  ;;  %s932_s25 = sshll.u32 %s1056_s21, 4  ;;  %s933_s25 = int_to_ptr.vmem [resolvable:$false] %s932_s25 }
  0x95   : > { %v819_v53 = vpop.eup %818  ;;  %v363_v5 = vadd.f32 %v360_v61, %v331_v32  ;;  %v1334_v9 = vstv %s322_s17  ;;  %p930_p6 = pnand %p929_p11, %p1534_p2  ;;  %s934_s26 = scalar_lea.vmem %s933_s25, 3072 }
  0x96   : > { %v821_v57 = vpop.eup %820  ;;  %v397_v58 = vmul.f32 %v819_v53, %v343_v10  ;;  %v389_v10 = vadd.f32 %v386_v60, %v362_v59  ;;  %p935_p3 = scmp.lt.s32.totalorder %s1374_s11, %s933_s25  ;;  %p936_p7 = scmp.lt.s32.totalorder %s934_s26, %s928_s9 }
  0x97   : > { %v823_v62 = vpop.eup %822  ;;  %v398_v0 = vmul.f32 %v821_v57, %v344_v14  ;;  %v390_v19 = vadd.f32 %v387_v1, %v363_v5  ;;  %p931_p10 = pneg %p930_p6 }
  0x98   : > { %v409_v2 = vmul.f32 0.5, %v397_v58  ;;  %v399_v4 = vmul.f32 %v823_v62, %v345_v25  ;;  %v825_v11 = vpop.eup %824  ;;  %p937_p5 = por %p936_p7, %p935_p3 }
  0x99   : > { %v410_v7 = vmul.f32 0.5, %v398_v0  ;;  %v406_v18 = vmul.f32 %v825_v11, %v349_v27 }
  0x9a   : > { %v412_v12 = vsub.f32 %v382_v54, %v409_v2  ;;  %v411_v13 = vmul.f32 0.5, %v399_v4  ;;  %v435_v15 = vadd.f32 %v409_v2, %v382_v54  ;;  %v827_v16 = vpop.eup %826  ;;  %v484_v2 = vld [vmem:[%s281_s2 + $0x8] sm:$0xff]  ;;  %p938_p8 = pnand %p937_p5, %p931_p10 }
  0x9b   : > { %v413_v17 = vsub.f32 %v383_v63, %v410_v7  ;;  %v436_v14 = vadd.f32 %v410_v7, %v383_v63  ;;  %v407_v22 = vmul.f32 %v827_v16, %v350_v41  ;;  %v422_v25 = vmul.f32 0.5, %v406_v18  ;;  %v483_v63 = vld [vmem:[%s281_s2] sm:$0xff] }
  0x9c   : > { %v415_v20 = vmax.f32 %v412_v12, 0.0  ;;  %v414_v21 = vsub.f32 %v384_v3, %v411_v13  ;;  %v438_v23 = vmax.f32 %v435_v15, 0.0  ;;  %v437_v28 = vadd.f32 %v411_v13, %v384_v3  ;;  %v829_v29 = vpop.eup %828 }
  0x9d   : > { %v416_v24 = vmax.f32 %v413_v17, 0.0  ;;  %v439_v26 = vmax.f32 %v436_v14, 0.0  ;;  %v423_v32 = vmul.f32 0.5, %v407_v22  ;;  %v425_v35 = vsub.f32 %v388_v8, %v422_v25 }
  0x9e   : > { %v419_v30 = vmin.f32 %v418_v6, %v415_v20  ;;  %v417_v31 = vmax.f32 %v414_v21, 0.0  ;;  %v441_v33 = vmin.f32 %v418_v6, %v438_v23  ;;  %v408_v27 = vmul.f32 %v829_v29, %v351_v51 }
  0x9f   : > { %v420_v34 = vmin.f32 %v418_v6, %v416_v24  ;;  %v442_v36 = vmin.f32 %v418_v6, %v439_v26  ;;  %v426_v38 = vsub.f32 %v389_v10, %v423_v32  ;;  %v440_v39 = vmax.f32 %v437_v28, 0.0 }
  0xa0   : > { %468 = vst [vmem:[%s1338_s14] sm:$0xff] %v419_v30  ;;  %v421_v37 = vmin.f32 %v418_v6, %v417_v31  ;;  %712 = vst [vmem:[%s1338_s14 + $0x30] sm:$0xff] %v441_v33  ;;  %v444_v40 = vadd.f32 %v422_v25, %v388_v8  ;;  %v428_v41 = vmax.f32 %v425_v35, 0.0  ;;  %v424_v42 = vmul.f32 0.5, %v408_v27 }
  0xa1   : > { %469 = vst [vmem:[%s1338_s14 + $0x8] sm:$0xff] %v420_v34  ;;  %713 = vst [vmem:[%s1338_s14 + $0x38] sm:$0xff] %v442_v36  ;;  %v445_v43 = vadd.f32 %v423_v32, %v389_v10  ;;  %v459_v44 = vsub.f32 %v441_v33, %v419_v30  ;;  %v429_v45 = vmax.f32 %v426_v38, 0.0  ;;  %v443_v46 = vmin.f32 %v418_v6, %v440_v39  ;;  %v485_v6 = vld [vmem:[%s281_s2 + $0x10] sm:$0xff] }
  0xa2   : > { %470 = vst [vmem:[%s1338_s14 + $0x10] sm:$0xff] %v421_v37  ;;  %v447_v47 = vmax.f32 %v444_v40, 0.0  ;;  %v460_v48 = vsub.f32 %v442_v36, %v420_v34  ;;  %v432_v49 = vmin.f32 %v1334_v9, %v428_v41  ;;  %v427_v50 = vsub.f32 %v390_v19, %v424_v42 }
  0xa3   : > { %v448_v51 = vmax.f32 %v445_v43, 0.0  ;;  %v446_v52 = vadd.f32 %v424_v42, %v390_v19  ;;  %v433_v53 = vmin.f32 %v1334_v9, %v429_v45  ;;  %714 = vst [vmem:[%s1338_s14 + $0x40] sm:$0xff] %v443_v46  ;;  %v461_v58 = vsub.f32 %v443_v46, %v421_v37 }
  0xa4   : > { %v450_v54 = vmin.f32 %v1334_v9, %v447_v47  ;;  %709 = vst [vmem:[%s1338_s14 + $0x18] sm:$0xff] %v432_v49  ;;  %v430_v55 = vmax.f32 %v427_v50, 0.0  ;;  %vm1356_vm0 = vcmp.gt.f32.partialorder %v459_v44, 4.0  ;;  %vm1370_vm1 = vcmp.gt.f32.partialorder %v460_v48, 4.0 }
  0xa5   : > { %v451_v56 = vmin.f32 %v1334_v9, %v448_v51  ;;  %v449_v57 = vmax.f32 %v446_v52, 0.0  ;;  %710 = vst [vmem:[%s1338_s14 + $0x20] sm:$0xff] %v433_v53  ;;  %vm1390_vm5 = vcmp.gt.f32.partialorder %v461_v58, 4.0 }
  0xa6   : > { %715 = vst [vmem:[%s1338_s14 + $0x48] sm:$0xff] %v450_v54  ;;  %v453_v59 = vsub.f32 %v450_v54, %v432_v49  ;;  %v434_v61 = vmin.f32 %v1334_v9, %v430_v55 }
  0xa7   : > { %716 = vst [vmem:[%s1338_s14 + $0x50] sm:$0xff] %v451_v56  ;;  %v452_v62 = vmin.f32 %v1334_v9, %v449_v57  ;;  %v454_v0 = vsub.f32 %v451_v56, %v433_v53 }
  0xa8   : > { %vm456_vm2 = vcmp.gt.f32.partialorder %v453_v59, 4.0  ;;  %711 = vst [vmem:[%s1338_s14 + $0x28] sm:$0xff] %v434_v61 }
  0xa9   : > { %717 = vst [vmem:[%s1338_s14 + $0x58] sm:$0xff] %v452_v62  ;;  %vm465_vm3 = vmand %vm456_vm2, %vm1356_vm0  ;;  %vm1386_vm4 = vcmp.gt.f32.partialorder %v454_v0, 4.0  ;;  %v455_v4 = vsub.f32 %v452_v62, %v434_v61 }
  0xaa   : > { %v486_v7 = vsel %vm465_vm3, %v483_v63, -1e+30  ;;  %vm466_vm6 = vmand %vm1386_vm4, %vm1370_vm1 }
  0xab   : > { %941 = shalt.err (!%p938_p8)
}
  0xac   : > { %s942_s17 = scalar_lea.hbm %s1363_s23, 1536  ;;  %s946_s10 = scalar_lea.hbm %s1500_s4, 3072 }
  0xad   : > { %p943_p1 = scmp.ne.s32.totalorder %s1363_s23, %s942_s17  ;;  %p947_p0 = scmp.lt.u32.totalorder %s1363_s23, %s1500_s4 }
  0xae   : > { %p948_p9 = scmp.lt.u32.totalorder %s946_s10, %s942_s17  ;;  %p950_p11 = scmp.lt.u32.totalorder %s942_s17, %s1363_s23 }
  0xaf   : > { %p944_p13 = pnand %p943_p1, %p1534_p2 }
  0xb0   : > { %p949_p4 = por %p948_p9, %p947_p0 }
  0xb1   : > { %p945_p12 = pneg %p944_p13 }
  0xb2   : > { %p951_p6 = por %p950_p11, %p949_p4 }
  0xb4   : > { %p952_p10 = pnand %p951_p6, %p945_p12 }
  0xb6   : > { %955 = shalt.err (!%p952_p10)
}
  0xb7   : > { %s1057_s2 = smov 128   ;;  %s1058_s9 = smov 8   ;;  %489 = vst [vmem:[%s1378_s3] sm:$0xff] %v486_v7  ;;  %v487_v8 = vsel %vm466_vm6, %v484_v2, -1e+30  ;;  %vm458_vm7 = vcmp.gt.f32.partialorder %v455_v4, 4.0 }
  0xb8   : > { %738 = dma.vmem_to_hbm [thread:$0]  (%p1534_p2), %s1374_s11, 1536, %s1363_s23, %s493_s18, %s1057_s2, %s1057_s2, %s1058_s9   ;;  %vm467_vm8 = vmand %vm458_vm7, %vm1390_vm5 }
  0xb9   : > { %490 = vst [vmem:[%s1378_s3 + $0x8] sm:$0xff] %v487_v8  ;;  %s1443_s18 = scalar_lea.hbm %s1501_s5, %s729_s27  ;;  %v488_v9 = vsel %vm467_vm8, %v485_v6, -1e+30  ;;  %s498_s21 = scalar_lea.sflag [#allocation12], %s1305_s24 }
  0xba   : > { %491 = vst [vmem:[%s1378_s3 + $0x10] sm:$0xff] %v488_v9  ;;  %s956_s25 = scalar_lea.vmem %s1428_s12, 384  ;;  %s1059_s26 = smov [#allocation11]  }
  0xbb   : > { %p957_p3 = scmp.ne.s32.totalorder %s1428_s12, %s956_s25  ;;  %s960_s17 = sshll.u32 %s1059_s26, 4  ;;  %s961_s17 = int_to_ptr.vmem [resolvable:$false] %s960_s17 }
  0xbc   : > { %s962_s14 = scalar_lea.vmem %s961_s17, 768  ;;  %p963_p8 = scmp.lt.s32.totalorder %s1428_s12, %s961_s17 }
  0xbd   : > { %p958_p7 = pnand %p957_p3, %p1534_p2  ;;  %p964_p1 = scmp.lt.s32.totalorder %s962_s14, %s956_s25 }
  0xbf   : > { %p959_p5 = pneg %p958_p7  ;;  %p965_p13 = por %p964_p1, %p963_p8 }
  0xc1   : > { %p966_p12 = pnand %p965_p13, %p959_p5 }
  0xc3   : > { %969 = shalt.err (!%p966_p12)
}
  0xc4   : > { %s970_s6 = scalar_lea.hbm %s1443_s18, 384  ;;  %s974_s15 = scalar_lea.hbm %s1501_s5, 768 }
  0xc5   : > { %p971_p0 = scmp.ne.s32.totalorder %s1443_s18, %s970_s6  ;;  %p975_p11 = scmp.lt.u32.totalorder %s1443_s18, %s1501_s5 }
  0xc6   : > { %p976_p6 = scmp.lt.u32.totalorder %s974_s15, %s970_s6  ;;  %p978_p3 = scmp.lt.u32.totalorder %s970_s6, %s1443_s18 }
  0xc7   : > { %p972_p9 = pnand %p971_p0, %p1534_p2 }
  0xc8   : > { %p977_p10 = por %p976_p6, %p975_p11 }
  0xc9   : > { %p973_p4 = pneg %p972_p9 }
  0xca   : > { %p979_p7 = por %p978_p3, %p977_p10 }
  0xcc   : > { %p980_p5 = pnand %p979_p7, %p973_p4 }
  0xce   : > { %983 = shalt.err (!%p980_p5)
}
  0xcf   : > { %739 = dma.vmem_to_hbm [thread:$0]  (%p1534_p2), %s1428_s12, 384, %s1443_s18, %s498_s21, %s1057_s2, %s1057_s2, %s1058_s9  }
  0xd0 PF: > { %s546_s19 = sand.u32 1, %s1028_s28   ;;  %p1535_p8 = scmp.ne.s32.totalorder %s1516_s22, 0 }
  0xd1   : > { %p1536_p1 = scmp.ge.s32.totalorder %s1048_s0, 2  ;;  %s547_s11 = scalar_lea.sflag [#allocation6], %s546_s19 }
  0xd3   : > { %p754_p13 = pnand %p1536_p1, %p1535_p8 }
  0xd5   : > { %1019 = dma.done.wait (!%p754_p13), %s547_s11, 1536  }
  0xd6   : > { %1021 = vsyncadd (!%p754_p13), %s547_s11, 4294965760  ;;  %s556_s20 = scalar_lea.sflag [#allocation12], %s546_s19 }
  0xd7   : > { %1023 = dma.done.wait (!%p754_p13), %s556_s20, 384  }
  0xd8   : > { %1025 = vsyncadd (!%p754_p13), %s556_s20, 4294966912  ;;  %s30_s0 = sadd.s32 1, %s1048_s0   ;;  %s1537_s28 = smov %s1032_s29 }
  0xd9   : > { %p27_p12 = scmp.ge.s32.totalorder %s30_s0, 4   ;;  %s1538_s29 = smov %s1036_s30 }
  0xda   : > { %s1539_s30 = smov %s1149_s13  ;;  %s1540_s6 = smov %s1044_s7 }
  0xdb   : > { %s1541_s7 = smov %s1543_s8  ;;  %29 = sbr.rel (!%p27_p12) target bundleno = 22 (0x16), region = 120 }
  0xe2   :  { %561 = vsyncpa [#allocation5], 1 }
  0xe3   :  { %563 = vsyncpa [#allocation5 + $0x1], 1 }
  0xe4   :  { %564 = vsyncpa [#allocation8], 1 }
  0xe5   :  { %566 = vsyncpa [#allocation8 + $0x1], 1 }
  0xe6   :  { %567 = vsyncpa [#allocation6], 1 }
  0xe7   :  { %569 = vsyncpa [#allocation6 + $0x1], 1 }
  0xe8   :  { %570 = vsyncpa [#allocation12], 1 }
  0xe9   :  { %572 = vsyncpa [#allocation12 + $0x1], 1 }

</bundles_post_ra>
